<compile_context>
chip_gen: v5e
topology: v5e:2x2
jax: 0.10.0
libtpu: 0.0.40
codegen_flags: <defaults>
</compile_context>

<pallas_src>
import functools

import jax
import jax.numpy as jnp
from jax import lax
from jax.experimental import pallas as pl
from jax.experimental.pallas import tpu as pltpu


def _shuffle_attention_kernel(x_ref, coef_ref, o_ref, *, hw, eps):
    """One grid step of ShuffleAttention.

    x_ref    : (nb, 2, mb, hw)   block of the input viewed as (b, 2, c//2, hw)
    coef_ref : (2, mb, 3)        packed per-channel (a, b, c) coefficients (f32)
    o_ref    : (nb, mb, 2*hw)    block of the shuffled-layout output (b, c//2, 2*hw)
    """
    x = x_ref[...].astype(jnp.float32)                      # stats always in f32
    inv_hw = jnp.float32(1.0 / hw)
    mu = jnp.sum(x, axis=-1, keepdims=True) * inv_hw        # (nb, 2, mb, 1)
    d = x - mu
    var = jnp.sum(d * d, axis=-1, keepdims=True) * inv_hw
    xn = d * lax.rsqrt(var + jnp.float32(eps))              # per-channel GroupNorm

    coef = coef_ref[...]                                    # (2, mb, 3)
    a = coef[:, :, 0:1]
    b = coef[:, :, 1:2]
    c = coef[:, :, 2:3]
    arg = a * xn + b * mu + c                               # broadcast -> (nb, 2, mb, hw)

    # x * sigmoid(arg) folded into a single divide; exp goes to the EUP slot.
    y = x / (1.0 + jnp.exp(-arg))

    # Channel shuffle: final channel 2*m+g comes from source channel g*(c//2)+m, so the
    # two processed halves are lane-concatenated into the (b, c//2, 2*hw) output layout.
    o_ref[...] = jnp.concatenate([y[:, 0], y[:, 1]], axis=-1).astype(o_ref.dtype)


def _choose_blocks(b, half, hw, itemsize, target_bytes=4 << 20, vmem_budget=44 << 20):
    """Pick (nb, mb, vmem_estimate).

    nb: batch items per block (divides b).  mb: channels-per-half per block (a multiple
    of 8 dividing `half`, or `half` itself) -> always a legal second-to-minor block dim.
    Aims for ~target-sized input tiles, a double-buffered footprint under `vmem_budget`
    (v7x-safe), and >= 4 grid steps so both v7x TensorCores get work.
    """
    lanes_in = -(-hw // 128) * 128            # VMEM lane padding of the input tile
    lanes_out = -(-(2 * hw) // 128) * 128     # ... and of the lane-concatenated output

    def estimate(nb_, mb_):
        mb8 = -(-mb_ // 8) * 8
        in_t = nb_ * 2 * mb8 * lanes_in * itemsize
        out_t = nb_ * mb8 * lanes_out * itemsize
        f32_t = nb_ * 2 * mb8 * lanes_in * 4
        # 2x in + 2x out (double buffering) + f32 working set + headroom.
        return in_t, 2 * in_t + 2 * out_t + 4 * f32_t + (2 << 20)

    m_cands = sorted({d for d in range(8, half + 1, 8) if half % d == 0} | {half})
    fitting = [m for m in m_cands
               if estimate(1, m)[0] <= target_bytes and estimate(1, m)[1] <= vmem_budget]
    # TODO(synk): for enormous hw with awkward `half` factorizations nothing may fit the
    # budget; the smallest candidate is the best we can do without splitting the hw
    # reduction across grid steps.
    mb = fitting[-1] if fitting else m_cands[0]
    nb = 1
    if mb == half:
        # A whole half fits: merge batch items to amortize per-step overhead, but keep
        # at least 4 grid steps when possible.
        for d in sorted(d for d in range(1, b + 1) if b % d == 0):
            steps = (b // d) * (half // mb)
            if (estimate(d, mb)[0] <= target_bytes
                    and estimate(d, mb)[1] <= vmem_budget
                    and (steps >= 4 or d == 1)):
                nb = d
    else:
        # If the grid is still too short for two cores, trade tile size for steps.
        while (b // nb) * (half // mb) < 4:
            smaller = [m for m in m_cands if m < mb]
            if not smaller:
                break
            mb = smaller[-1]
    return nb, mb, estimate(nb, mb)[1]


def shuffle_attention(x, params, G, eps=1e-5):
    """Pallas implementation of ShuffleAttention.forward.  x: (b, c, h, w)."""
    b, c, h, w = x.shape
    assert c % (2 * G) == 0, (c, G)
    c2 = c // (2 * G)            # channels per branch per group
    half = c // 2                # channels per shuffle half
    hw = h * w

    # Zero-copy input view; the output is declared directly in the shuffled layout.
    x_view = x.reshape(b, 2, half, hw)

    # Fold both branches' affine params into packed per-channel (a, b, c) coefficients:
    #   channel rows:  a = 0,             b = cweight,  c = cbias
    #   spatial rows:  a = sweight*gn_w,  b = 0,        c = sweight*gn_b + sbias
    f32 = jnp.float32
    cw = params["cweight"].reshape(-1).astype(f32)
    cb = params["cbias"].reshape(-1).astype(f32)
    sw = params["sweight"].reshape(-1).astype(f32)
    sb = params["sbias"].reshape(-1).astype(f32)
    gnw = params["gn_weight"].reshape(-1).astype(f32)
    gnb = params["gn_bias"].reshape(-1).astype(f32)
    zeros = jnp.zeros((c2,), f32)
    a_ch = jnp.tile(jnp.concatenate([zeros, sw * gnw]), G)          # (c,)
    b_ch = jnp.tile(jnp.concatenate([cw, zeros]), G)
    c_ch = jnp.tile(jnp.concatenate([cb, sw * gnb + sb]), G)
    coef = jnp.stack([a_ch, b_ch, c_ch], axis=-1).reshape(2, half, 3)

    nb, mb, vmem_est = _choose_blocks(b, half, hw, x.dtype.itemsize)
    # Batch blocks iterate fastest -> the tiny coefficient block is only re-fetched when
    # the channel block changes.
    grid = (half // mb, b // nb)

    in_specs = [
        pl.BlockSpec((nb, 2, mb, hw), lambda mi, bi: (bi, 0, mi, 0)),
        pl.BlockSpec((2, mb, 3), lambda mi, bi: (0, mi, 0)),
    ]
    out_specs = pl.BlockSpec((nb, mb, 2 * hw), lambda mi, bi: (bi, mi, 0))

    vmem_limit = int(min(48 << 20, max(16 << 20, vmem_est)))   # <= 48 MiB: safe on v7x

    kernel = functools.partial(_shuffle_attention_kernel, hw=hw, eps=eps)
    out = pl.pallas_call(
        kernel,
        out_shape=jax.ShapeDtypeStruct((b, half, 2 * hw), x.dtype),
        grid_spec=pltpu.PrefetchScalarGridSpec(
            num_scalar_prefetch=0,
            grid=grid,
            in_specs=in_specs,
            out_specs=out_specs,
        ),
        compiler_params=pltpu.CompilerParams(
            dimension_semantics=("parallel", "parallel"),
            vmem_limit_bytes=vmem_limit,
        ),
    )(x_view, coef)

    # (b, c//2, 2*hw) is exactly the channel-shuffled memory layout: zero-copy reshape.
    return out.reshape(b, c, h, w)


def shuffle_attention_ref(x, params, G, eps=1e-5):
    """Pure-JAX reference mirroring the PyTorch forward (f32 internals)."""
    b, c, h, w = x.shape
    c2 = c // (2 * G)
    xf = x.astype(jnp.float32)
    xg = xf.reshape(b * G, c // G, h, w)
    x0, x1 = xg[:, :c2], xg[:, c2:]

    def p4(p):
        return p.reshape(1, c2, 1, 1).astype(jnp.float32)

    cw, cb = p4(params["cweight"]), p4(params["cbias"])
    sw, sb = p4(params["sweight"]), p4(params["sbias"])
    gnw, gnb = p4(params["gn_weight"]), p4(params["gn_bias"])

    pooled = jnp.mean(x0, axis=(2, 3), keepdims=True)
    x_channel = x0 * jax.nn.sigmoid(cw * pooled + cb)

    mu = jnp.mean(x1, axis=(2, 3), keepdims=True)
    var = jnp.mean((x1 - mu) ** 2, axis=(2, 3), keepdims=True)
    xn = (x1 - mu) / jnp.sqrt(var + eps)
    x_spatial = x1 * jax.nn.sigmoid(sw * (gnw * xn + gnb) + sb)

    out = jnp.concatenate([x_channel, x_spatial], axis=1).reshape(b, c, h, w)
    out = out.reshape(b, 2, c // 2, h, w).transpose(0, 2, 1, 3, 4).reshape(b, c, h, w)
    return out.astype(x.dtype)


if __name__ == "__main__":
    root = jax.random.PRNGKey(0)

    def run_case(idx, bsz, channel, h, w, G, dtype=jnp.float32, atol=1e-5, rtol=1e-5):
        c2 = channel // (2 * G)
        kx = jax.random.fold_in(root, idx)
        x = jax.random.normal(kx, (bsz, channel, h, w), dtype=jnp.float32).astype(dtype)
        # Deterministic nonzero params so every term of the forward path is exercised.
        params = {
            "cweight": jnp.linspace(-0.5, 0.5, c2, dtype=jnp.float32),
            "cbias": jnp.ones((c2,), jnp.float32),
            "sweight": jnp.linspace(0.2, 1.0, c2, dtype=jnp.float32),
            "sbias": jnp.ones((c2,), jnp.float32),
            "gn_weight": jnp.linspace(0.8, 1.2, c2, dtype=jnp.float32),
            "gn_bias": jnp.linspace(-0.1, 0.1, c2, dtype=jnp.float32),
        }
        out = jax.block_until_ready(shuffle_attention(x, params, G))
        ref = jax.block_until_ready(shuffle_attention_ref(x, params, G))
        assert out.shape == (bsz, channel, h, w), out.shape
        assert out.dtype == x.dtype, out.dtype
        o32 = out.astype(jnp.float32)
        r32 = ref.astype(jnp.float32)
        diff = jnp.max(jnp.abs(o32 - r32))
        assert jnp.allclose(o32, r32, atol=atol, rtol=rtol), \
            f"case {idx}: max abs diff {diff}"

    run_case(0, 2, 8, 16, 16, G=2)                                    # hw=256, aligned
    run_case(1, 2, 8, 12, 12, G=2)                                    # hw=144, unaligned
    run_case(2, 2, 32, 8, 8, G=4)                                     # larger c//2 = 16
    run_case(3, 2, 8, 16, 16, G=2, dtype=jnp.bfloat16, atol=5e-2, rtol=5e-2)
    print("KERNEL_OK")
</pallas_src>

<mosaic_0001>
module attributes {stable_mosaic.version = 11 : i64} {
  func.func @_shuffle_attention_kernel(%arg0: i32, %arg1: i32, %arg2: memref<1x2x4x256xf32, #tpu.memory_space<vmem>>, %arg3: memref<2x4x3xf32, #tpu.memory_space<vmem>>, %arg4: memref<1x4x512xf32, #tpu.memory_space<vmem>>) attributes {dimension_semantics = [#tpu.dimension_semantics<parallel>, #tpu.dimension_semantics<parallel>], iteration_bounds = array<i64: 1, 2>, scalar_prefetch = 0 : i64, scratch_operands = 0 : i64, tpu.core_type = #tpu.core_type<tc>, window_params = [{transform_indices = @transform_0, window_bounds = array<i64: 1, 2, 4, 256>}, {transform_indices = @transform_1, window_bounds = array<i64: 2, 4, 3>}, {transform_indices = @transform_2, window_bounds = array<i64: 1, 4, 512>}]} {
    %c0 = arith.constant 0 : index
    %c0_0 = arith.constant 0 : index
    %c0_1 = arith.constant 0 : index
    %c0_2 = arith.constant 0 : index
    %0 = vector.load %arg2[%c0, %c0_0, %c0_1, %c0_2] : memref<1x2x4x256xf32, #tpu.memory_space<vmem>>, vector<1x2x4x256xf32>
    %cst = arith.constant dense<0.000000e+00> : vector<1x2x4xf32>
    %1 = vector.multi_reduction <add>, %0, %cst [3] : vector<1x2x4x256xf32> to vector<1x2x4xf32>
    %2 = vector.shape_cast %1 : vector<1x2x4xf32> to vector<1x2x4x1xf32>
    %cst_3 = arith.constant 3.906250e-03 : f32
    %3 = vector.broadcast %cst_3 : f32 to vector<1x2x4x1xf32>
    %4 = arith.mulf %2, %3 : vector<1x2x4x1xf32>
    %5 = vector.broadcast %4 : vector<1x2x4x1xf32> to vector<1x2x4x256xf32>
    %6 = arith.subf %0, %5 : vector<1x2x4x256xf32>
    %7 = arith.mulf %6, %6 : vector<1x2x4x256xf32>
    %cst_4 = arith.constant dense<0.000000e+00> : vector<1x2x4xf32>
    %8 = vector.multi_reduction <add>, %7, %cst_4 [3] : vector<1x2x4x256xf32> to vector<1x2x4xf32>
    %9 = vector.shape_cast %8 : vector<1x2x4xf32> to vector<1x2x4x1xf32>
    %cst_5 = arith.constant 3.906250e-03 : f32
    %10 = vector.broadcast %cst_5 : f32 to vector<1x2x4x1xf32>
    %11 = arith.mulf %9, %10 : vector<1x2x4x1xf32>
    %cst_6 = arith.constant 9.99999974E-6 : f32
    %12 = vector.broadcast %cst_6 : f32 to vector<1x2x4x1xf32>
    %13 = arith.addf %11, %12 : vector<1x2x4x1xf32>
    %14 = math.rsqrt %13 : vector<1x2x4x1xf32>
    %15 = vector.broadcast %14 : vector<1x2x4x1xf32> to vector<1x2x4x256xf32>
    %16 = arith.mulf %6, %15 : vector<1x2x4x256xf32>
    %c0_7 = arith.constant 0 : index
    %c0_8 = arith.constant 0 : index
    %c0_9 = arith.constant 0 : index
    %17 = vector.load %arg3[%c0_7, %c0_8, %c0_9] : memref<2x4x3xf32, #tpu.memory_space<vmem>>, vector<2x4x3xf32>
    %18 = vector.extract_strided_slice %17 {offsets = [0, 0, 0], sizes = [2, 4, 1], strides = [1, 1, 1]} : vector<2x4x3xf32> to vector<2x4x1xf32>
    %19 = vector.extract_strided_slice %17 {offsets = [0, 0, 1], sizes = [2, 4, 1], strides = [1, 1, 1]} : vector<2x4x3xf32> to vector<2x4x1xf32>
    %20 = vector.extract_strided_slice %17 {offsets = [0, 0, 2], sizes = [2, 4, 1], strides = [1, 1, 1]} : vector<2x4x3xf32> to vector<2x4x1xf32>
    %21 = vector.shape_cast %18 : vector<2x4x1xf32> to vector<1x2x4x1xf32>
    %22 = vector.broadcast %21 : vector<1x2x4x1xf32> to vector<1x2x4x256xf32>
    %23 = arith.mulf %22, %16 : vector<1x2x4x256xf32>
    %24 = vector.shape_cast %19 : vector<2x4x1xf32> to vector<1x2x4x1xf32>
    %25 = arith.mulf %24, %4 : vector<1x2x4x1xf32>
    %26 = vector.broadcast %25 : vector<1x2x4x1xf32> to vector<1x2x4x256xf32>
    %27 = arith.addf %23, %26 : vector<1x2x4x256xf32>
    %28 = vector.shape_cast %20 : vector<2x4x1xf32> to vector<1x2x4x1xf32>
    %29 = vector.broadcast %28 : vector<1x2x4x1xf32> to vector<1x2x4x256xf32>
    %30 = arith.addf %27, %29 : vector<1x2x4x256xf32>
    %cst_10 = arith.constant 0.000000e+00 : f32
    %31 = vector.broadcast %cst_10 : f32 to vector<1x2x4x256xf32>
    %32 = arith.subf %31, %30 : vector<1x2x4x256xf32>
    %33 = math.exp %32 : vector<1x2x4x256xf32>
    %cst_11 = arith.constant 1.000000e+00 : f32
    %34 = vector.broadcast %cst_11 : f32 to vector<1x2x4x256xf32>
    %35 = arith.addf %34, %33 : vector<1x2x4x256xf32>
    %36 = arith.divf %0, %35 : vector<1x2x4x256xf32>
    %37 = vector.extract_strided_slice %36 {offsets = [0, 0, 0, 0], sizes = [1, 1, 4, 256], strides = [1, 1, 1, 1]} : vector<1x2x4x256xf32> to vector<1x1x4x256xf32>
    %38 = vector.shape_cast %37 : vector<1x1x4x256xf32> to vector<1x4x256xf32>
    %39 = vector.extract_strided_slice %36 {offsets = [0, 1, 0, 0], sizes = [1, 1, 4, 256], strides = [1, 1, 1, 1]} : vector<1x2x4x256xf32> to vector<1x1x4x256xf32>
    %40 = vector.shape_cast %39 : vector<1x1x4x256xf32> to vector<1x4x256xf32>
    %41 = tpu.concatenate %38, %40 in 2 : vector<1x4x256xf32>, vector<1x4x256xf32> -> vector<1x4x512xf32>
    %c0_12 = arith.constant 0 : index
    %c0_13 = arith.constant 0 : index
    %c0_14 = arith.constant 0 : index
    %42 = vector.load %arg4[%c0_12, %c0_13, %c0_14] : memref<1x4x512xf32, #tpu.memory_space<vmem>>, vector<1x4x512xf32>
    tpu.vector_store %arg4[%c0_12, %c0_13, %c0_14], %41 {strides = array<i32>} : memref<1x4x512xf32, #tpu.memory_space<vmem>>, vector<1x4x512xf32>,
    return
  }
  func.func @transform_0(%arg0: i32, %arg1: i32) -> (i32, i32, i32, i32) {
    %c0_i32 = arith.constant 0 : i32
    %c0_i32_0 = arith.constant 0 : i32
    %c0_i32_1 = arith.constant 0 : i32
    return %arg1, %c0_i32, %arg0, %c0_i32_0 : i32, i32, i32, i32
  }
  func.func @transform_1(%arg0: i32, %arg1: i32) -> (i32, i32, i32) {
    %c0_i32 = arith.constant 0 : i32
    %c0_i32_0 = arith.constant 0 : i32
    %c0_i32_1 = arith.constant 0 : i32
    return %c0_i32, %arg0, %c0_i32_0 : i32, i32, i32
  }
  func.func @transform_2(%arg0: i32, %arg1: i32) -> (i32, i32, i32) {
    %c0_i32 = arith.constant 0 : i32
    %c0_i32_0 = arith.constant 0 : i32
    return %arg1, %arg0, %c0_i32 : i32, i32, i32
  }
}

</mosaic_0001>

<bundles_post_ra>
// kernel: tpu_custom_call.1
= control target key start
LH: loop header
LB: loop body
LE: loop exit
PB: predicated region body
PF: predicated region fallthrough
CT: control target
= control target key end

     0   :  { %7 = vsyncpa [#allocation3], 0  ;;  %s951_s0 = inlined_call_operand.hbm [shape: f32[2,2,4,256], index: 0, kind: input, shape index: {}]   ;;  %s952_s1 = inlined_call_operand.vmem [shape: f32[2,4,3], index: 1, kind: input, shape index: {}]   ;;  %s953_s2 = inlined_call_operand.hbm [shape: f32[2,4,512], index: 2, kind: output, shape index: {}]  }
   0x1   :  { %9 = vsyncpa [#allocation3 + $0x1], 0 }
   0x2   :  { %10 = vsyncpa [#allocation4], 0 }
   0x3   :  { %12 = vsyncpa [#allocation4 + $0x1], 0  ;;  %s793_s9 = smov 0   ;;  %s795_s10 = smov 0  }
   0x4   :  { %s797_s11 = smov 0   ;;  %s799_s12 = smov 0  }
   0x5   :  { %s801_s13 = smov 0   ;;  %s803_s14 = smov 0  }
   0x6 LB: > { %s551_s15 = sadd.s32 4294967295, %s770_s14   ;;  %s552_s16 = sadd.s32 4294967294, %s770_s14   ;;  %s770_s14 = sphi %s803_s14, %s18_s14   ;;  %s766_s13 = sphi %s801_s13, %s962_s13   ;;  %s762_s12 = sphi %s799_s12, %s961_s12   ;;  %s758_s11 = sphi %s797_s11, %s960_s11   ;;  %s754_s10 = sphi %s795_s10, %s959_s10   ;;  %s750_s9 = sphi %s793_s9, %s958_s9  }
   0x7   : > { %s27_s17 = sadd.s32 1, %s766_s13  ;;  %s39_s18 = sadd.s32 1, %s758_s11 }
   0x8   : > { %p28_p0 = scmp.ge.s32.totalorder %s27_s17, 2  ;;  %p46_p1 = scmp.ne.s32.totalorder %s758_s11, %s754_s10 }
   0x9   : > { %p47_p2 = scmp.eq.s32.totalorder %s770_s14, 0  ;;  %p52_p3 = scmp.ne.s32.totalorder %s754_s10, %s750_s9 }
   0xa   : > { %s964_s17 = smov (%p28_p0, %s27_s17), 0  ;;  %p53_p5 = scmp.eq.s32.totalorder %s551_s15, 0 }
   0xb   : > { %p834_p4 = por %p47_p2, %p46_p1  ;;  %s34_s20 = ssub.s32 %s766_s13, %s964_s17 }
   0xc   : > { %p104_p6 = scmp.eq.s32.totalorder %s551_s15, 1  ;;  %p37_p7 = scmp.eq.s32.totalorder %s34_s20, 0 }
   0xd   : > { %p840_p8 = por %p53_p5, %p52_p3  ;;  %p110_p10 = scmp.eq.s32.totalorder %s552_s16, 1 }
   0xe   : > { %p844_p9 = por %p104_p6, %p46_p1  ;;  %p555_p12 = scmp.ge.s32.totalorder %s770_s14, 2 }
   0xf   : > { %s849_s23 = scalar_select %p37_p7, %s758_s11, %s39_s18  }
  0x10   : > { %p851_p11 = por %p110_p10, %p52_p3  ;;  %p581_p13 = scmp.lt.s32.totalorder %s770_s14, 2 }
  0x11   : > { %s137_s25 = sand.u32 1, %s758_s11   ;;  %s567_s27 = sshll.u32 %s766_s13, 4 }
  0x12   : > { %s556_s26 = sshll.u32 %s137_s25, 4  ;;  %s148_s30 = scalar_lea.hbm %s951_s0, %s567_s27 }
  0x13   : > { %s141_s3 = scalar_lea.vmem [#allocation2], %s556_s26  ;;  %s149_s5 = sshll.u32 %s148_s30, 4  ;;  %s150_s5 = int_to_ptr.hbm [resolvable:$true] %s149_s5 }
  0x14   : > { %s151_s4 = sshll.u32 %s141_s3, 4  ;;  %p574_p0 = pnand %p581_p13, %p834_p4  ;;  %s152_s4 = int_to_ptr.vmem [resolvable:$true] %s151_s4 }
  0x15   : > { %p559_p1 = scmp.ge.s32.totalorder %s770_s14, 1  ;;  %s138_s6 = scalar_lea.sflag [#allocation3], %s137_s25 }
  0x16   : > { %s772_s7 = smov 128   ;;  %s773_s8 = smov 8  }
  0x17   : > { %576 = dma.hbm_to_vmem [thread:$0]  (!%p574_p0), %s150_s5, 256, %s152_s4, %s138_s6, %s772_s7, %s772_s7, %s773_s8  }
  0x18   : > { %p159_p2 = scmp.lt.s32.totalorder %s770_s14, 3 }
  0x1a   : > { %p160_p3 = pnand %p559_p1, %p159_p2 }
  0x1b   : > { %s867_s15 = sand.u32 (!%p160_p3), 1, %s754_s10  }
  0x1c   : > { %163 = sbr.rel (%p160_p3) target bundleno = 395 (0x18b), region = 28  ;;  %s560_s16 = sshll.u32 (!%p160_p3), %s867_s15, 4 }
  0x1d   : > { %s166_s18 = scalar_lea.sflag (!%p160_p3), [#allocation3], %s867_s15  ;;  %s169_s19 = scalar_lea.vmem (!%p160_p3), [#allocation2], %s560_s16 }
  0x21   : > { %741 = dma.done.wait (%p840_p8), %s166_s18, 256  }
  0x22   : > { %743 = vsyncadd (%p840_p8), %s166_s18, 4294967040  ;;  %v774_v0 = vmov 0   ;;  %v877_v1 = vld [vmem:[%s169_s19] sm:$0xff]  ;;  %v879_v2 = vld [vmem:[%s169_s19 + $0x8] sm:$0xff]  ;;  %vm214_vm0 = vcmask 1043456   ;;  %v775_v14 = vmov 1  }
  0x23   : > { %637 = vset.pattern.permute.xlu2 %v774_v0  ;;  %640 = vset.pattern.permute.xlu1 %v774_v0  ;;  %v304_v3 = vld [vmem:[%s952_s1] sm:$0xf]  ;;  %203 = vst [vmem:[#allocation1] ss:$2 sm:$0xff] %v877_v1  ;;  %v776_v15 = vmov 839922192  }
  0x24   : > { %308 = vperm.xlu2 %637, %v304_v3   ;;  %207 = vst [vmem:[#allocation1 + $0x10] ss:$2 sm:$0xff] %v879_v2  ;;  %v230_v16 = vunpack.c.l.s4 %v776_v15  ;;  %v777_v17 = vmov 2   ;;  %v305_v25 = vld [vmem:[%s952_s1 + $0x4] sm:$0xf]  ;;  %s568_s27 = sshll.u32 %s762_s12, 4 }
  0x25   : > { %639 = vset.pattern.permute.xlu0 %v777_v17  ;;  %s194_s28 = scalar_lea.vmem [#allocation5], %s560_s16  ;;  %s447_s3 = scalar_lea.hbm %s953_s2, %s568_s27 }
  0x26   : > { %v890_v18 = vunpack.c.0.s8 %v230_v16  ;;  %s449_s4 = sshll.u32 %s194_s28, 4  ;;  %s451_s5 = sshll.u32 %s447_s3, 4  ;;  %s450_s4 = int_to_ptr.vmem [resolvable:$true] %s449_s4  ;;  %s452_s5 = int_to_ptr.hbm [resolvable:$true] %s451_s5 }
  0x27   : > { %s434_s12 = scalar_lea.sflag [#allocation4], %s867_s15  ;;  %s702_s6 = sshra.s32 %s452_s5, 4  ;;  %s703_s6 = int_to_ptr.hbm [resolvable:$true] %s702_s6 }
  0x28   : > { %s704_s7 = scalar_lea.hbm %s703_s6, 16  ;;  %s708_s18 = scalar_lea.hbm %s953_s2, 32 }
  0x29   : > { %p705_p4 = scmp.ne.s32.totalorder %s703_s6, %s704_s7  ;;  %p709_p7 = scmp.lt.s32.totalorder %s703_s6, %s953_s2 }
  0x2a   : > { %v204_v4 = vld.sshfl [vmem:[#allocation1] sm:$0xff pattern:$0x75316420]  ;;  %v205_v5 = vld.sshfl [vmem:[#allocation1 + $0x8] sm:$0xff pattern:$0x75316420]  ;;  %p710_p8 = scmp.lt.s32.totalorder %s708_s18, %s704_s7 }
  0x2b   : > { %v215_v6 = vsel %vm214_vm0, %v204_v4, 0.0  ;;  %v216_v7 = vsel %vm214_vm0, %v205_v5, 0.0  ;;  %v208_v9 = vld.sshfl [vmem:[#allocation1 + $0x10] sm:$0xff pattern:$0x75316420]  ;;  %p706_p5 = pnand %p705_p4, %p844_p9 }
  0x2c   : > { %v217_v8 = vadd.f32 %v216_v7, %v215_v6  ;;  %v209_v10 = vld.sshfl [vmem:[#allocation1 + $0x18] sm:$0xff pattern:$0x75316420]  ;;  %v220_v11 = vsel %vm214_vm0, %v208_v9, 0.0  ;;  %638 = vset.pattern.permute.xlu2 %v775_v14  ;;  %p711_p10 = por %p710_p8, %p709_p7 }
  0x2d   : > { %v221_v12 = vsel %vm214_vm0, %v209_v10, 0.0  ;;  %p707_p6 = pneg %p706_p5 }
  0x2e   : > { %218 = vadd.xlane.f32.xlu0 %v217_v8  ;;  %v222_v13 = vadd.f32 %v221_v12, %v220_v11 }
  0x2f   : > { %p712_p13 = pnand %p711_p10, %p707_p6 }
  0x36   : > { %223 = vadd.xlane.f32.xlu0 %v222_v13 }
  0x4a   : > { %350 = vperm.xlu0 %639, %v304_v3  }
  0x7e   : > { %v309_v51 = vpop.permute.xlu2 %308 }
  0xa1   : > { %v219_v19 = vpop.xlane.xlu0 %218 }
  0xa2   : > { %v225_v20 = vmul.f32 0.00390625, %v219_v19 }
  0xa4   : > { %v232_v21 = vperm.slane %v225_v20, %v890_v18  ;;  %v333_v22 = vmul.f32 %v304_v3, %v225_v20 }
  0xa6   : > { %v239_v23 = vsub.f32 %v877_v1, %v232_v21  ;;  %337 = vperm.xlu2 %638, %v333_v22  }
  0xa8   : > { %v241_v24 = vmul.f32 %v239_v23, %v239_v23 }
  0xa9   : > { %v224_v26 = vpop.xlane.xlu0 %223 }
  0xaa   : > { %245 = vst [vmem:[#allocation1] ss:$2 sm:$0xff] %v241_v24  ;;  %v226_v27 = vmul.f32 0.00390625, %v224_v26 }
  0xac   : > { %v236_v28 = vperm.slane %v226_v27, %v890_v18  ;;  %v334_v29 = vmul.f32 %v305_v25, %v226_v27 }
  0xae   : > { %v240_v30 = vsub.f32 %v879_v2, %v236_v28  ;;  %342 = vperm.xlu2 %638, %v334_v29  }
  0xb0   : > { %v242_v31 = vmul.f32 %v240_v30, %v240_v30 }
  0xb1   : > { %v246_v32 = vld.sshfl [vmem:[#allocation1] sm:$0xff pattern:$0x75316420]  ;;  %v247_v33 = vld.sshfl [vmem:[#allocation1 + $0x8] sm:$0xff pattern:$0x75316420] }
  0xb2   : > { %249 = vst [vmem:[#allocation1 + $0x10] ss:$2 sm:$0xff] %v242_v31  ;;  %v256_v34 = vsel %vm214_vm0, %v246_v32, 0.0  ;;  %v257_v35 = vsel %vm214_vm0, %v247_v33, 0.0 }
  0xb3   : > { %v258_v36 = vadd.f32 %v257_v35, %v256_v34 }
  0xb5   : > { %259 = vadd.xlane.f32.xlu1 %v258_v36 }
  0xb6   : > { %641 = vset.pattern.permute.xlu2 %v777_v17 }
  0xb7   : > { %354 = vperm.xlu2 %641, %v305_v25  }
  0xb9   : > { %v250_v37 = vld.sshfl [vmem:[#allocation1 + $0x10] sm:$0xff pattern:$0x75316420]  ;;  %v251_v38 = vld.sshfl [vmem:[#allocation1 + $0x18] sm:$0xff pattern:$0x75316420] }
  0xba   : > { %v261_v39 = vsel %vm214_vm0, %v250_v37, 0.0  ;;  %v262_v40 = vsel %vm214_vm0, %v251_v38, 0.0 }
  0xbb   : > { %v263_v41 = vadd.f32 %v262_v40, %v261_v39 }
  0xbc   : > { %v351_v11 = vpop.permute.xlu0 %350 }
  0xbd   : > { %264 = vadd.xlane.f32.xlu1 %v263_v41 }
  0xd6   : > { %313 = vperm.xlu1 %640, %v305_v25  }
 0x100   : > { %v338_v62 = vpop.permute.xlu2 %337 }
 0x108   : > { %v343_v10 = vpop.permute.xlu2 %342 }
 0x111   : > { %v355_v25 = vpop.permute.xlu2 %354 }
 0x128   : > { %v260_v42 = vpop.xlane.xlu1 %259 }
 0x129   : > { %v266_v43 = vmul.f32 0.00390625, %v260_v42 }
 0x12b   : > { %v268_v44 = vadd.f32 1e-05, %v266_v43 }
 0x12d   : > { %642 = vrsqrt.f32 %v268_v44  ;;  %vm276_vm2 = vweird.f32 %v268_v44 }
 0x130   : > { %v265_v45 = vpop.xlane.xlu1 %264 }
 0x131   : > { %v267_v46 = vmul.f32 0.00390625, %v265_v45 }
 0x133   : > { %v643_v47 = vpop.eup %642  ;;  %v269_v48 = vadd.f32 1e-05, %v267_v46 }
 0x134   : > { %v271_v49 = vmul.f32 %v643_v47, %v268_v44  ;;  %vm277_vm1 = vweird.f32 %v643_v47 }
 0x135   : > { %644 = vrsqrt.f32 %v269_v48  ;;  %vm278_vm3 = vmor %vm276_vm2, %vm277_vm1  ;;  %vm286_vm5 = vweird.f32 %v269_v48 }
 0x136   : > { %v272_v50 = vmul.f32 %v643_v47, %v271_v49 }
 0x138   : > { %v273_v52 = vmul.f32 0.5, %v272_v50 }
 0x13a   : > { %v274_v53 = vsub.f32 1.5, %v273_v52 }
 0x13b   : > { %v645_v54 = vpop.eup %644 }
 0x13c   : > { %v275_v55 = vmul.f32 %v643_v47, %v274_v53  ;;  %v281_v56 = vmul.f32 %v645_v54, %v269_v48  ;;  %vm287_vm4 = vweird.f32 %v645_v54 }
 0x13d   : > { %vm288_vm6 = vmor %vm286_vm5, %vm287_vm4 }
 0x13e   : > { %v279_v57 = vsel %vm278_vm3, %v643_v47, %v275_v55  ;;  %v282_v58 = vmul.f32 %v645_v54, %v281_v56 }
 0x13f   : > { %v295_v59 = vperm.slane %v279_v57, %v890_v18 }
 0x140   : > { %v283_v60 = vmul.f32 0.5, %v282_v58 }
 0x141   : > { %v302_v61 = vmul.f32 %v295_v59, %v239_v23 }
 0x142   : > { %v284_v63 = vsub.f32 1.5, %v283_v60 }
 0x143   : > { %318 = vst [vmem:[#allocation1] ss:$2 sm:$0xff] %v302_v61 }
 0x144   : > { %v285_v0 = vmul.f32 %v645_v54, %v284_v63 }
 0x146   : > { %v289_v3 = vsel %vm288_vm6, %v645_v54, %v285_v0 }
 0x147   : > { %v299_v4 = vperm.slane %v289_v3, %v890_v18 }
 0x148   : > { %v314_v16 = vpop.permute.xlu1 %313 }
 0x149   : > { %v303_v5 = vmul.f32 %v299_v4, %v240_v30 }
 0x14a   : > { %v319_v6 = vld.sshfl [vmem:[#allocation1] sm:$0xff pattern:$0x75316420]  ;;  %v320_v7 = vld.sshfl [vmem:[#allocation1 + $0x8] sm:$0xff pattern:$0x75316420] }
 0x14b   : > { %322 = vst [vmem:[#allocation1 + $0x10] ss:$2 sm:$0xff] %v303_v5  ;;  %v329_v8 = vmul.f32 %v319_v6, %v309_v51  ;;  %v330_v9 = vmul.f32 %v320_v7, %v309_v51 }
 0x14d   : > { %v345_v12 = vadd.f32 %v338_v62, %v329_v8  ;;  %v346_v13 = vadd.f32 %v338_v62, %v330_v9 }
 0x14f   : > { %v357_v14 = vadd.f32 %v351_v11, %v345_v12  ;;  %v358_v15 = vadd.f32 %v351_v11, %v346_v13 }
 0x151   : > { %v361_v17 = vsub.f32 0.0, %v357_v14  ;;  %v362_v19 = vsub.f32 0.0, %v358_v15 }
 0x152   : > { %v323_v20 = vld.sshfl [vmem:[#allocation1 + $0x10] sm:$0xff pattern:$0x75316420]  ;;  %v324_v21 = vld.sshfl [vmem:[#allocation1 + $0x18] sm:$0xff pattern:$0x75316420] }
 0x153   : > { %v365_v22 = vmul.f32 1.442695, %v361_v17  ;;  %v367_v23 = vmul.f32 1.442695, %v362_v19  ;;  %v331_v18 = vmul.f32 %v323_v20, %v314_v16  ;;  %v332_v24 = vmul.f32 %v324_v21, %v314_v16 }
 0x155   : > { %646 = vpow2.f32 %v365_v22  ;;  %v347_v26 = vadd.f32 %v343_v10, %v331_v18  ;;  %v348_v27 = vadd.f32 %v343_v10, %v332_v24 }
 0x156   : > { %648 = vpow2.f32 %v367_v23 }
 0x157   : > { %v359_v28 = vadd.f32 %v355_v25, %v347_v26  ;;  %v360_v29 = vadd.f32 %v355_v25, %v348_v27 }
 0x159   : > { %v363_v30 = vsub.f32 0.0, %v359_v28  ;;  %v364_v31 = vsub.f32 0.0, %v360_v29 }
 0x15b   : > { %v647_v32 = vpop.eup %646  ;;  %v369_v33 = vmul.f32 1.442695, %v363_v30  ;;  %v371_v34 = vmul.f32 1.442695, %v364_v31 }
 0x15c   : > { %v649_v35 = vpop.eup %648  ;;  %v373_v37 = vadd.f32 1.0, %v647_v32 }
 0x15d   : > { %v374_v36 = vadd.f32 1.0, %v649_v35  ;;  %650 = vpow2.f32 %v369_v33 }
 0x15e   : > { %652 = vpow2.f32 %v371_v34 }
 0x15f   : > { %v381_v38 = vrot.slane %v374_v36, 4 }
 0x161   : > { %v383_v39 = vsel %vm214_vm0, %v373_v37, %v381_v38 }
 0x162   : > { %654 = vrcp.f32 %v383_v39  ;;  %v398_v49 = vand.u32 2147483648, %v383_v39  ;;  %v396_v51 = vand.u32 2147483647, %v383_v39  ;;  %vm392_vm8 = vweird.f32 %v383_v39 }
 0x163   : > { %v651_v40 = vpop.eup %650 }
 0x164   : > { %v653_v41 = vpop.eup %652  ;;  %v375_v43 = vadd.f32 1.0, %v651_v40  ;;  %v399_v54 = vor.u32 1.1754944e-38, %v398_v49  ;;  %vm397_vm10 = vcmp.eq.f32.partialorder %v396_v51, 8.507059e+37 }
 0x165   : > { %v376_v42 = vadd.f32 1.0, %v653_v41 }
 0x167   : > { %v382_v44 = vrot.slane %v376_v42, 4 }
 0x168   : > { %v655_v45 = vpop.eup %654 }
 0x169   : > { %v388_v46 = vmul.f32 %v655_v45, %v383_v39  ;;  %v384_v47 = vsel %vm214_vm0, %v375_v43, %v382_v44  ;;  %vm393_vm7 = vweird.f32 %v655_v45 }
 0x16a   : > { %656 = vrcp.f32 %v384_v47  ;;  %vm394_vm9 = vmor %vm392_vm8, %vm393_vm7  ;;  %v413_v60 = vand.u32 2147483648, %v384_v47  ;;  %v411_v62 = vand.u32 2147483647, %v384_v47  ;;  %vm407_vm12 = vweird.f32 %v384_v47 }
 0x16b   : > { %v389_v48 = vsub.f32 1.0, %v388_v46 }
 0x16c   : > { %v414_v0 = vor.u32 1.1754944e-38, %v413_v60  ;;  %vm412_vm14 = vcmp.eq.f32.partialorder %v411_v62, 8.507059e+37 }
 0x16d   : > { %v390_v50 = vmul.f32 %v655_v45, %v389_v48 }
 0x16f   : > { %v391_v52 = vadd.f32 %v655_v45, %v390_v50 }
 0x170   : > { %v657_v53 = vpop.eup %656 }
 0x171   : > { %v395_v55 = vsel %vm394_vm9, %v655_v45, %v391_v52  ;;  %v403_v56 = vmul.f32 %v657_v53, %v384_v47  ;;  %vm408_vm11 = vweird.f32 %v657_v53 }
 0x172   : > { %v400_v57 = vsel %vm397_vm10, %v399_v54, %v395_v55  ;;  %vm409_vm13 = vmor %vm407_vm12, %vm408_vm11 }
 0x173   : > { %v401_v58 = vmul.f32 %v400_v57, %v877_v1  ;;  %v404_v59 = vsub.f32 1.0, %v403_v56 }
 0x175   : > { %418 = vst [vmem:[#allocation1] ss:$2 sm:$0xff] %v401_v58  ;;  %v405_v61 = vmul.f32 %v657_v53, %v404_v59 }
 0x177   : > { %v406_v63 = vadd.f32 %v657_v53, %v405_v61 }
 0x179   : > { %v410_v3 = vsel %vm409_vm13, %v657_v53, %v406_v63 }
 0x17a   : > { %v415_v4 = vsel %vm412_vm14, %v414_v0, %v410_v3 }
 0x17b   : > { %v416_v5 = vmul.f32 %v415_v4, %v879_v2 }
 0x17c   : > { %v419_v6 = vld.sshfl [vmem:[#allocation1] sm:$0xff pattern:$0x75316420]  ;;  %v420_v7 = vld.sshfl [vmem:[#allocation1 + $0x8] sm:$0xff pattern:$0x75316420] }
 0x17d   : > { %422 = vst [vmem:[#allocation1] ss:$2 sm:$0xff] %v416_v5  ;;  %v425_v1 = vrot.slane %v420_v7, 4 }
 0x17f   : > { %v427_v8 = vsel %vm214_vm0, %v419_v6, %v425_v1 }
 0x180   : > { %431 = vst [vmem:[%s194_s28] sm:$0xff] %v427_v8 }
 0x184   : > { %v424_v9 = vld.sshfl [vmem:[#allocation1 + $0x8] sm:$0xff pattern:$0x75316420]  ;;  %v423_v10 = vld.sshfl [vmem:[#allocation1] sm:$0xff pattern:$0x75316420] }
 0x185   : > { %v426_v2 = vrot.slane %v424_v9, 4 }
 0x187   : > { %v428_v11 = vsel %vm214_vm0, %v423_v10, %v426_v2 }
 0x188   : > { %432 = vst [vmem:[%s194_s28 + $0x8] sm:$0xff] %v428_v11 }
 0x189   : > { %715 = shalt.err (!%p712_p13)
}
 0x18a   : > { %571 = dma.vmem_to_hbm [thread:$0]  (%p844_p9), %s450_s4, 256, %s452_s5, %s434_s12  }
 0x18b PF: > { %s463_s15 = sand.u32 1, %s750_s9   ;;  %p578_p0 = pnand %p555_p12, %p851_p11 }
 0x18c   : > { %s464_s25 = scalar_lea.sflag [#allocation4], %s463_s15 }
 0x18d   : > { %p579_p1 = pneg %p578_p0 }
 0x18f   : > { %745 = dma.done.wait (%p579_p1), %s464_s25, 256  }
 0x190   : > { %747 = vsyncadd (%p579_p1), %s464_s25, 4294967040  ;;  %s18_s14 = sadd.s32 1, %s770_s14   ;;  %s958_s9 = smov %s754_s10 }
 0x191   : > { %p15_p2 = scmp.ge.s32.totalorder %s18_s14, 4   ;;  %s959_s10 = smov %s758_s11 }
 0x192   : > { %s960_s11 = smov %s849_s23  ;;  %s961_s12 = smov %s766_s13 }
 0x193   : > { %s962_s13 = smov %s964_s17  ;;  %17 = sbr.rel (!%p15_p2) target bundleno = 6 (0x6), region = 79 }
 0x198   :  { %470 = vsyncpa [#allocation3], 1 }
 0x199   :  { %472 = vsyncpa [#allocation3 + $0x1], 1 }
 0x19a   :  { %473 = vsyncpa [#allocation4], 1 }
 0x19b   :  { %475 = vsyncpa [#allocation4 + $0x1], 1 }

</bundles_post_ra>
